<compile_context>
chip_gen: v6e
topology: v6e:2x2x1
jax: 0.10.0
libtpu: 0.0.40
codegen_flags: <defaults>
</compile_context>

<pallas_src>
import functools

import jax
import jax.numpy as jnp
from jax.experimental import pallas as pl
from jax.experimental.pallas import tpu as pltpu

_MIB = 1024 * 1024


def _vmem_capacity_bytes():
    """Physical VMEM of the local TPU generation (conservative fallback)."""
    try:
        info = pltpu.get_tpu_info()
        cap = getattr(info, "vmem_capacity_bytes", None)
        if cap:
            return int(cap)
    except Exception:
        pass
    return 64 * _MIB  # v7x-sized fallback: safe on every generation.


def _budgets():
    """(vmem_limit_bytes, target_tile_bytes) for this chip generation."""
    cap = _vmem_capacity_bytes()
    if cap >= 100 * _MIB:            # v5e / v6e: 128 MiB physical VMEM
        return 64 * _MIB, 8 * _MIB
    return 48 * _MIB, 4 * _MIB       # v7x: 64 MiB physical VMEM


def _largest_tile_rows(rows, sub, target_rows):
    """Largest divisor of `rows` that is a multiple of `sub` and <= target."""
    if rows % sub != 0:
        return None
    m = rows // sub
    best = None
    i = 1
    while i * i <= m:
        if m % i == 0:
            for q in (i, m // i):
                cand = q * sub
                if cand <= target_rows and (best is None or cand > best):
                    best = cand
        i += 1
    return best


# ---------------------------------------------------------------------------
# Kernels
# ---------------------------------------------------------------------------

def _onepass_kernel(x_ref, o_ref, *, inv_n):
    """Whole slab resident in VMEM: sum + subtract in a single invocation."""
    x = x_ref[...].astype(jnp.float32)
    mean = jnp.sum(x) * inv_n
    o_ref[...] = (x - mean).astype(o_ref.dtype)


def _partial_sum_kernel(x_ref, p_ref):
    """Per-tile partial sum, broadcast into an (8,128)-aligned output block."""
    s = jnp.sum(x_ref[...], dtype=jnp.float32)
    p_ref[...] = jnp.full(p_ref.shape, s, dtype=jnp.float32)


def _subtract_kernel(mean_ref, x_ref, o_ref):
    """Subtract the precombined global mean (SMEM scalar) from one tile."""
    m = mean_ref[0]
    o_ref[...] = (x_ref[...].astype(jnp.float32) - m).astype(o_ref.dtype)


# ---------------------------------------------------------------------------
# Wrapper
# ---------------------------------------------------------------------------

def centered_layer(x):
    """X - X.mean() over all elements. Keeps the shape and dtype of x."""
    orig_shape = x.shape
    n = int(x.size)
    itemsize = jnp.dtype(x.dtype).itemsize
    sub = max(8, 32 // itemsize)           # sublane multiple for this dtype
    vmem_limit, tile_bytes = _budgets()

    # ---- choose a lane-dense slab (last dim a multiple of 128) ------------
    lanes = None
    for cand in (8192, 4096, 2048, 1024, 512, 256, 128):
        if n % cand == 0 and (n // cand) % sub == 0:
            lanes = cand
            break
    if lanes is None:
        for cand in (8192, 4096, 2048, 1024, 512, 256, 128):
            if n % cand == 0:
                lanes = cand
                break
    pad_elems = 0
    if lanes is None:
        # Ragged element count: pad the tail up to full 128-lane rows.
        # TODO(synk): mask the tail in-kernel instead of this pad/slice pair.
        lanes = 128
        rows = -(-n // lanes)
        pad_elems = rows * lanes - n
    else:
        rows = n // lanes

    inv_n = 1.0 / float(n)
    xf = x.reshape(-1)
    if pad_elems:
        xf = jnp.pad(xf, (0, pad_elems))   # zeros do not perturb the sum

    # ---- single-pass fast path: slab (+ f32 temps) fits in VMEM ------------
    slab_bytes = rows * lanes * itemsize
    f32_bytes = rows * lanes * 4
    if 2 * slab_bytes + 2 * f32_bytes <= int(0.8 * vmem_limit):
        x2d = xf.reshape(rows, lanes)
        out2d = pl.pallas_call(
            functools.partial(_onepass_kernel, inv_n=inv_n),
            out_shape=jax.ShapeDtypeStruct((rows, lanes), x.dtype),
            in_specs=[pl.BlockSpec(memory_space=pltpu.MemorySpace.VMEM)],
            out_specs=pl.BlockSpec(memory_space=pltpu.MemorySpace.VMEM),
            compiler_params=pltpu.CompilerParams(vmem_limit_bytes=vmem_limit),
        )(x2d)
        out = out2d.reshape(-1)
        if pad_elems:
            out = out[:n]
        return out.reshape(orig_shape)

    # ---- streaming path: two parallel passes over ~tile_bytes tiles --------
    target_rows = max(sub, (tile_bytes // (lanes * itemsize)) // sub * sub)
    tile_rows = _largest_tile_rows(rows, sub, target_rows)
    if tile_rows is None:
        # Ragged row count: pad rows up to a tile multiple.
        # TODO(synk): mask the tail tile in-kernel to avoid this extra copy.
        tile_rows = target_rows
        rows_padded = -(-rows // tile_rows) * tile_rows
        extra = (rows_padded - rows) * lanes
        xf = jnp.pad(xf, (0, extra))
        pad_elems += extra
        rows = rows_padded

    x2d = xf.reshape(rows, lanes)
    num_tiles = rows // tile_rows
    common = pltpu.CompilerParams(
        dimension_semantics=("parallel",),   # no carried state -> megacore OK
        vmem_limit_bytes=vmem_limit,
    )

    # Pass 1: per-tile partial sums, combined outside by a tiny jnp.sum.
    partials = pl.pallas_call(
        _partial_sum_kernel,
        out_shape=jax.ShapeDtypeStruct((num_tiles, 8, 128), jnp.float32),
        grid_spec=pltpu.PrefetchScalarGridSpec(
            num_scalar_prefetch=0,
            grid=(num_tiles,),
            in_specs=[pl.BlockSpec((tile_rows, lanes), lambda i: (i, 0))],
            out_specs=pl.BlockSpec((1, 8, 128), lambda i: (i, 0, 0)),
        ),
        compiler_params=common,
    )(x2d)
    mean = (jnp.sum(partials[:, 0, 0]) * inv_n).astype(jnp.float32).reshape(1)

    # Pass 2: subtract the mean (SMEM scalar); tiles fully independent.
    out2d = pl.pallas_call(
        _subtract_kernel,
        out_shape=jax.ShapeDtypeStruct((rows, lanes), x.dtype),
        grid_spec=pltpu.PrefetchScalarGridSpec(
            num_scalar_prefetch=0,
            grid=(num_tiles,),
            in_specs=[
                pl.BlockSpec(memory_space=pltpu.MemorySpace.SMEM),
                pl.BlockSpec((tile_rows, lanes), lambda i: (i, 0)),
            ],
            out_specs=pl.BlockSpec((tile_rows, lanes), lambda i: (i, 0)),
        ),
        compiler_params=common,
    )(mean, x2d)

    out = out2d.reshape(-1)
    if pad_elems:
        out = out[:n]
    return out.reshape(orig_shape)


if __name__ == "__main__":
    key = jax.random.PRNGKey(0)
    x = jax.random.normal(key, (2, 4, 16, 16), dtype=jnp.float32)  # NCHW

    y = jax.block_until_ready(centered_layer(x))

    # Reference check against plain JAX.
    ref = x - jnp.mean(x)
    assert y.shape == x.shape and y.dtype == x.dtype
    assert jnp.allclose(y, ref, atol=1e-5, rtol=1e-5)
    # Centered output should have ~zero mean.
    assert jnp.abs(jnp.mean(y)) < 1e-5

    print("KERNEL_OK")
</pallas_src>

<mosaic_0001>
module attributes {stable_mosaic.version = 11 : i64} {
  func.func @_onepass_kernel(%arg0: memref<8x256xf32, #tpu.memory_space<vmem>>, %arg1: memref<8x256xf32, #tpu.memory_space<vmem>>) attributes {dimension_semantics = [], scalar_prefetch = 0 : i64, scratch_operands = 0 : i64, tpu.core_type = #tpu.core_type<tc>} {
    %c0 = arith.constant 0 : index
    %c0_0 = arith.constant 0 : index
    %0 = vector.load %arg0[%c0, %c0_0] : memref<8x256xf32, #tpu.memory_space<vmem>>, vector<8x256xf32>
    %1 = vector.shape_cast %0 : vector<8x256xf32> to vector<1x8x256xf32>
    %cst = arith.constant dense<0.000000e+00> : vector<1xf32>
    %2 = vector.multi_reduction <add>, %1, %cst [1, 2] : vector<1x8x256xf32> to vector<1xf32>
    %3 = vector.shape_cast %2 : vector<1xf32> to vector<1x1x1xf32>
    %4 = vector.extract %3[0, 0, 0] : f32 from vector<1x1x1xf32>
    %cst_1 = arith.constant 4.8828125E-4 : f32
    %5 = arith.mulf %4, %cst_1 : f32
    %6 = vector.broadcast %5 : f32 to vector<8x256xf32>
    %7 = arith.subf %0, %6 : vector<8x256xf32>
    %c0_2 = arith.constant 0 : index
    %c0_3 = arith.constant 0 : index
    %8 = vector.load %arg1[%c0_2, %c0_3] : memref<8x256xf32, #tpu.memory_space<vmem>>, vector<8x256xf32>
    tpu.vector_store %arg1[%c0_2, %c0_3], %7 {strides = array<i32>} : memref<8x256xf32, #tpu.memory_space<vmem>>, vector<8x256xf32>,
    return
  }
}

</mosaic_0001>

<bundles_post_ra>
// kernel: tpu_custom_call.1
= control target key start
LH: loop header
LB: loop body
LE: loop exit
PB: predicated region body
PF: predicated region fallthrough
CT: control target
= control target key end

     0   :  { %6 = vsyncpa [#allocation3], 0  ;;  %s120_s0 = inlined_call_operand.hbm [shape: f32[8,256], index: 0, kind: input, shape index: {}]   ;;  %s121_s1 = inlined_call_operand.hbm [shape: f32[8,256], index: 1, kind: output, shape index: {}]  }
   0x1   :  { %7 = vsyncpa [#allocation4], 0  ;;  %s102_s6 = smov [#allocation2]  }
   0x2   :  { %s14_s7 = sshll.u32 %s102_s6, 4  ;;  %s15_s7 = int_to_ptr.vmem [resolvable:$true] %s14_s7 }
   0x3   :  { %s66_s8 = scalar_lea.vmem %s15_s7, 256  ;;  %p71_p1 = scmp.lt.s32.totalorder %s15_s7, %s15_s7 }
   0x4   :  { %p67_p0 = scmp.ne.s32.totalorder %s15_s7, %s66_s8  ;;  %p72_p2 = scmp.lt.s32.totalorder %s66_s8, %s66_s8 }
   0x6   :  { %p73_p3 = por %p72_p2, %p71_p1 }
   0x8   :  { %p74_p4 = pnand %p73_p3, %p67_p0 }
   0xa   :  { %77 = shalt.err (!%p74_p4)
}
   0xb   :  { %17 = dma.hbm_to_vmem [thread:$0]  %s120_s0, 256, %s15_s7, [#allocation3]  }
   0xc   :  { %98 = dma.done.wait [#allocation3], 256  }
   0xd   :  { %99 = vsyncadd [#allocation3], 4294967040  ;;  %v21_v0 = vld [vmem:[#allocation2] sm:$0xff]  ;;  %v22_v1 = vld [vmem:[#allocation2 + $0x8] sm:$0xff]  ;;  %s103_s13 = smov [#allocation5]  }
   0xe   :  { %v23_v2 = vadd.f32 %v22_v1, %v21_v0  ;;  %s45_s14 = sshll.u32 %s103_s13, 4  ;;  %s46_s14 = int_to_ptr.vmem [resolvable:$true] %s45_s14 }
   0xf   :  { %s78_s0 = scalar_lea.vmem %s46_s14, 256  ;;  %p83_p6 = scmp.lt.s32.totalorder %s46_s14, %s46_s14 }
  0x10   :  { %24 = vadd.xlane.f32.xlu0 %v23_v2  ;;  %p79_p5 = scmp.ne.s32.totalorder %s46_s14, %s78_s0  ;;  %p84_p7 = scmp.lt.s32.totalorder %s78_s0, %s78_s0 }
  0x12   :  { %p85_p8 = por %p84_p7, %p83_p6 }
  0x14   :  { %p86_p9 = pnand %p85_p8, %p79_p5 }
  0x99   :  { %v25_v3 = vpop.xlane.xlu0 %24 }
  0x9a   :  { %v26_v4 = vrot.slane %v25_v3, 4 }
  0x9c   :  { %v27_v5 = vadd.f32 %v26_v4, %v25_v3 }
  0x9e   :  { %v28_v6 = vrot.slane %v27_v5, 2 }
  0xa0   :  { %v29_v7 = vadd.f32 %v28_v6, %v27_v5 }
  0xa2   :  { %v30_v8 = vrot.slane %v29_v7, 1 }
  0xa4   :  { %v31_v9 = vadd.f32 %v30_v8, %v29_v7 }
  0xa6   :  { %54 = vpush %v31_v9 }
  0xd7   :  { %s55_s11 = spop %54 }
  0xd8   :  { %s33_s12 = smul.f32 0.00048828125, %s55_s11 }
  0xda   :  { %v34_v10 = vstv %s33_s12 }
  0xdb   :  { %v35_v11 = vsub.f32 %v21_v0, %v34_v10  ;;  %v36_v12 = vsub.f32 %v22_v1, %v34_v10 }
  0xdd   :  { %37 = vst [vmem:[#allocation5] sm:$0xff] %v35_v11  ;;  %38 = vst [vmem:[#allocation5 + $0x8] sm:$0xff] %v36_v12 }
  0xde   :  { %89 = shalt.err (!%p86_p9)
}
  0xdf   :  { %48 = dma.vmem_to_hbm [thread:$0]  %s46_s14, 256, %s121_s1, [#allocation4]  }
  0xe0   :  { %100 = dma.done.wait [#allocation4], 256  }
  0xe1   :  { %101 = vsyncadd [#allocation4], 4294967040 }
  0xe2   :  { %52 = vsyncpa [#allocation3], 1 }
  0xe3   :  { %53 = vsyncpa [#allocation4], 1 }

</bundles_post_ra>
